<compile_context>
chip_gen: v6e
topology: v6e:2x2x1
jax: 0.10.0
libtpu: 0.0.40
codegen_flags: <defaults>
</compile_context>

<pallas_src>
import functools
import math

import jax
import jax.numpy as jnp
from jax.experimental import pallas as pl
from jax.experimental.pallas import tpu as pltpu


def _layernorm(x, w, b, eps):
    mu = jnp.mean(x, axis=-1, keepdims=True)
    xc = x - mu
    var = jnp.mean(xc * xc, axis=-1, keepdims=True)
    return xc * jax.lax.rsqrt(var + eps) * w + b


def _encoder_layer_kernel(
    x_ref,      # (T, E)   flat tokens, T = S * N
    w_in_ref,   # (E, 3E)  packed in_proj (pre-transposed, Q-scale folded)
    w_out_ref,  # (E, E)   out_proj (pre-transposed)
    w1_ref,     # (E, H)   FF linear1 (bn0 folded)
    w2_ref,     # (H, E)   FF linear2 (bn1 folded)
    p_ref,      # (8, P)   packed row params (biases / LN affines), lane-padded
    o_ref,      # (T, E)
    *, num_heads, n_batch, eps,
):
    x = x_ref[...]                                   # (T, E)
    T, E = x.shape
    H = w1_ref.shape[1]
    hd = E // num_heads

    # ---- unpack row parameters (each in its own padded row) ----
    b_in  = p_ref[0:1, 0:3 * E]                      # (1, 3E)  (Q-scale folded)
    b_out = p_ref[1:2, 0:E]
    ln1_w = p_ref[2:3, 0:E]
    ln1_b = p_ref[3:4, 0:E]
    b1    = p_ref[4:5, 0:H]                          # bn0 folded
    b2    = p_ref[5:6, 0:E]                          # bn1 folded
    ln2_w = p_ref[6:7, 0:E]
    ln2_b = p_ref[7:8, 0:E]

    # ---- self-attention (MultiheadAttention, dropout=0, no user mask) ----
    # One batched QKV projection over all N*S tokens.
    qkv = jnp.dot(x, w_in_ref[...], preferred_element_type=jnp.float32) + b_in

    # Cross-batch mask: token row r belongs to batch (r % n_batch).
    ri = jax.lax.broadcasted_iota(jnp.int32, (T, T), 0)
    ci = jax.lax.broadcasted_iota(jnp.int32, (T, T), 1)
    same_batch = (ri % n_batch) == (ci % n_batch)
    neg_inf = jnp.float32(-1e30)

    attn = jnp.zeros((T, E), jnp.float32)
    for h in range(num_heads):
        qh = qkv[:, h * hd:(h + 1) * hd]                     # (T, hd) (scale folded)
        kh = qkv[:, E + h * hd:E + (h + 1) * hd]             # (T, hd)
        vh = qkv[:, 2 * E + h * hd:2 * E + (h + 1) * hd]     # (T, hd)
        s = jax.lax.dot_general(qh, kh, (((1,), (1,)), ((), ())),
                                preferred_element_type=jnp.float32)   # (T, T)
        s = jnp.where(same_batch, s, neg_inf)
        s = s - jnp.max(s, axis=-1, keepdims=True)
        p = jnp.exp(s)
        p = p * pl.reciprocal(jnp.sum(p, axis=-1, keepdims=True), approx=True)
        oh = jnp.dot(p, vh, preferred_element_type=jnp.float32)       # (T, hd)
        # distribute the out-projection into the head loop (no concatenate)
        attn = attn + jnp.dot(oh, w_out_ref[h * hd:(h + 1) * hd, :],
                              preferred_element_type=jnp.float32)     # (T, E)
    attn = attn + b_out

    # ---- residual + LayerNorm1 (norm_first=False path) ----
    y = _layernorm(x + attn, ln1_w, ln1_b, eps)

    # ---- FF block: SpecificLinearToLinearModule((E, H, E)), eval mode ----
    # BatchNorm affines pre-folded into w1/b1 and w2/b2.
    h1 = jnp.dot(y, w1_ref[...], preferred_element_type=jnp.float32) + b1
    h1 = jnp.maximum(h1, 0.0)                        # relu (module_index != 0)
    ff = jnp.dot(h1, w2_ref[...], preferred_element_type=jnp.float32) + b2

    # ---- residual + LayerNorm2 ----
    z = _layernorm(y + ff, ln2_w, ln2_b, eps)
    o_ref[...] = z.astype(o_ref.dtype)


def expanded_transformer_encoder_layer(src, params, *, num_heads, ln_eps=1e-5):
    """src: (S, N, E) float32 (PyTorch batch_first=False). Returns (S, N, E)."""
    S, N, E = src.shape
    T = S * N
    hd = E // num_heads
    H = params["lin1_w"].shape[0]

    f32 = lambda a: jnp.asarray(a, jnp.float32)

    # ---- parameter prep (exact algebraic folds, done once) ----
    # fold 1/sqrt(head_dim) into the Q third of in_proj
    scale = 1.0 / math.sqrt(hd)
    q_scale = jnp.concatenate([jnp.full((E,), scale, jnp.float32),
                               jnp.ones((2 * E,), jnp.float32)])
    w_in = f32(params["in_proj_w"]).T * q_scale[None, :]           # (E, 3E)
    b_in = f32(params["in_proj_b"]) * q_scale                      # (3E,)

    w_out = f32(params["out_proj_w"]).T                            # (E, E)
    b_out = f32(params["out_proj_b"])                              # (E,)

    # fold eval-mode BatchNorm affines into the FF linears
    bn0_s, bn0_t = f32(params["bn0_scale"]), f32(params["bn0_shift"])
    bn1_s, bn1_t = f32(params["bn1_scale"]), f32(params["bn1_shift"])
    w1 = f32(params["lin1_w"]).T                                   # (E, H)
    w2 = f32(params["lin2_w"]).T                                   # (H, E)
    w1f = bn0_s[:, None] * w1
    b1f = bn0_t @ w1 + f32(params["lin1_b"])
    w2f = bn1_s[:, None] * w2
    b2f = bn1_t @ w2 + f32(params["lin2_b"])

    # pack the small row params into one lane-padded (8, P) array
    rows = [b_in, b_out, f32(params["ln1_w"]), f32(params["ln1_b"]),
            b1f, b2f, f32(params["ln2_w"]), f32(params["ln2_b"])]
    width = ((max(r.shape[0] for r in rows) + 127) // 128) * 128
    packed = jnp.stack([jnp.pad(r, (0, width - r.shape[0])) for r in rows])

    # flat token view: contiguous reshape, no transpose / HBM round trip
    x2d = f32(src).reshape(T, E)

    args = (x2d, w_in, w_out, w1f, w2f, packed)

    def full_spec(a):
        return pl.BlockSpec(a.shape, lambda i: (0,) * a.ndim)

    kernel = functools.partial(_encoder_layer_kernel,
                               num_heads=num_heads, n_batch=N, eps=ln_eps)
    out2d = pl.pallas_call(
        kernel,
        out_shape=jax.ShapeDtypeStruct((T, E), jnp.float32),
        grid_spec=pltpu.PrefetchScalarGridSpec(
            num_scalar_prefetch=0,
            grid=(1,),
            in_specs=[full_spec(a) for a in args],
            out_specs=pl.BlockSpec((T, E), lambda i: (0, 0)),
        ),
        compiler_params=pltpu.CompilerParams(dimension_semantics=("arbitrary",)),
    )(*args)
    return out2d.reshape(S, N, E)


def build_params(key, E, H):
    """Deterministic synthetic parameters matching the module's __init__ shapes.
    Linear weights random; LayerNorm/BatchNorm use PyTorch fresh-init values."""
    ks = jax.random.split(key, 8)

    def rnd(k, shape, scale=0.1):
        return scale * jax.random.normal(k, shape, dtype=jnp.float32)

    bn_eps = 1e-5
    p = {
        # MultiheadAttention packed in_proj (3E, E) + bias, out_proj (E, E) + bias
        "in_proj_w": rnd(ks[0], (3 * E, E)),
        "in_proj_b": rnd(ks[1], (3 * E,)),
        "out_proj_w": rnd(ks[2], (E, E)),
        "out_proj_b": rnd(ks[3], (E,)),
        # LayerNorm(E) x2, PyTorch default init
        "ln1_w": jnp.ones((E,), jnp.float32), "ln1_b": jnp.zeros((E,), jnp.float32),
        "ln2_w": jnp.ones((E,), jnp.float32), "ln2_b": jnp.zeros((E,), jnp.float32),
        # SpecificLinearToLinearModule(layer_sizes=(E, H, E)): Linear(E->H), Linear(H->E)
        "lin1_w": rnd(ks[4], (H, E)), "lin1_b": rnd(ks[5], (H,)),
        "lin2_w": rnd(ks[6], (E, H)), "lin2_b": rnd(ks[7], (E,)),
        # BatchNorm1d eval-mode folded affine: w=1, b=0, running_mean=0, running_var=1
        "bn0_scale": jnp.ones((E,), jnp.float32) / jnp.sqrt(1.0 + bn_eps),
        "bn0_shift": jnp.zeros((E,), jnp.float32),
        "bn1_scale": jnp.ones((H,), jnp.float32) / jnp.sqrt(1.0 + bn_eps),
        "bn1_shift": jnp.zeros((H,), jnp.float32),
    }
    return p


if __name__ == "__main__":
    S, N, E, H = 8, 2, 32, 64          # input_layer_sizes = (32, 64, 32)
    NUM_HEADS = 4                      # see TODO(synk) at top re: E**2 heads

    key = jax.random.PRNGKey(0)
    kx, kp = jax.random.split(key)
    src = jax.random.normal(kx, (S, N, E), dtype=jnp.float32)
    params = build_params(kp, E, H)

    out = expanded_transformer_encoder_layer(src, params, num_heads=NUM_HEADS)
    out = jax.block_until_ready(out)

    assert out.shape == (S, N, E), out.shape
    assert bool(jnp.all(jnp.isfinite(out)))
    print("KERNEL_OK")
</pallas_src>

<mosaic_0001>
module attributes {stable_mosaic.version = 11 : i64} {
  func.func @_encoder_layer_kernel(%arg0: i32, %arg1: memref<16x32xf32, #tpu.memory_space<vmem>>, %arg2: memref<32x96xf32, #tpu.memory_space<vmem>>, %arg3: memref<32x32xf32, #tpu.memory_space<vmem>>, %arg4: memref<32x64xf32, #tpu.memory_space<vmem>>, %arg5: memref<64x32xf32, #tpu.memory_space<vmem>>, %arg6: memref<8x128xf32, #tpu.memory_space<vmem>>, %arg7: memref<16x32xf32, #tpu.memory_space<vmem>>) attributes {dimension_semantics = [#tpu.dimension_semantics<arbitrary>], iteration_bounds = array<i64: 1>, scalar_prefetch = 0 : i64, scratch_operands = 0 : i64, tpu.core_type = #tpu.core_type<tc>, window_params = [{pipeline_mode = #tpu.pipeline_mode<synchronous>, transform_indices = @transform_0, window_bounds = array<i64: 16, 32>}, {pipeline_mode = #tpu.pipeline_mode<synchronous>, transform_indices = @transform_1, window_bounds = array<i64: 32, 96>}, {pipeline_mode = #tpu.pipeline_mode<synchronous>, transform_indices = @transform_2, window_bounds = array<i64: 32, 32>}, {pipeline_mode = #tpu.pipeline_mode<synchronous>, transform_indices = @transform_3, window_bounds = array<i64: 32, 64>}, {pipeline_mode = #tpu.pipeline_mode<synchronous>, transform_indices = @transform_4, window_bounds = array<i64: 64, 32>}, {pipeline_mode = #tpu.pipeline_mode<synchronous>, transform_indices = @transform_5, window_bounds = array<i64: 8, 128>}, {pipeline_mode = #tpu.pipeline_mode<synchronous>, transform_indices = @transform_6, window_bounds = array<i64: 16, 32>}]} {
    %c0 = arith.constant 0 : index
    %c0_0 = arith.constant 0 : index
    %0 = vector.load %arg1[%c0, %c0_0] : memref<16x32xf32, #tpu.memory_space<vmem>>, vector<16x32xf32>
    %c0_1 = arith.constant 0 : index
    %c0_2 = arith.constant 0 : index
    %1 = vector.load %arg6[%c0_1, %c0_2] : memref<8x128xf32, #tpu.memory_space<vmem>>, vector<1x96xf32>
    %c1 = arith.constant 1 : index
    %c0_3 = arith.constant 0 : index
    %2 = vector.load %arg6[%c1, %c0_3] : memref<8x128xf32, #tpu.memory_space<vmem>>, vector<1x32xf32>
    %c2 = arith.constant 2 : index
    %c0_4 = arith.constant 0 : index
    %3 = vector.load %arg6[%c2, %c0_4] : memref<8x128xf32, #tpu.memory_space<vmem>>, vector<1x32xf32>
    %c3 = arith.constant 3 : index
    %c0_5 = arith.constant 0 : index
    %4 = vector.load %arg6[%c3, %c0_5] : memref<8x128xf32, #tpu.memory_space<vmem>>, vector<1x32xf32>
    %c4 = arith.constant 4 : index
    %c0_6 = arith.constant 0 : index
    %5 = vector.load %arg6[%c4, %c0_6] : memref<8x128xf32, #tpu.memory_space<vmem>>, vector<1x64xf32>
    %c5 = arith.constant 5 : index
    %c0_7 = arith.constant 0 : index
    %6 = vector.load %arg6[%c5, %c0_7] : memref<8x128xf32, #tpu.memory_space<vmem>>, vector<1x32xf32>
    %c6 = arith.constant 6 : index
    %c0_8 = arith.constant 0 : index
    %7 = vector.load %arg6[%c6, %c0_8] : memref<8x128xf32, #tpu.memory_space<vmem>>, vector<1x32xf32>
    %c7 = arith.constant 7 : index
    %c0_9 = arith.constant 0 : index
    %8 = vector.load %arg6[%c7, %c0_9] : memref<8x128xf32, #tpu.memory_space<vmem>>, vector<1x32xf32>
    %c0_10 = arith.constant 0 : index
    %c0_11 = arith.constant 0 : index
    %9 = vector.load %arg2[%c0_10, %c0_11] : memref<32x96xf32, #tpu.memory_space<vmem>>, vector<32x96xf32>
    %cst = arith.constant dense<0.000000e+00> : vector<16x96xf32>
    %10 = tpu.matmul %0, %9, %cst {dimension_numbers = #tpu.dot_dimension_numbers<[1], [0], [0], [1], [0, 0, 1, 1], [], []>} : vector<16x32xf32>, vector<32x96xf32>, vector<16x96xf32> -> vector<16x96xf32>
    %11 = vector.broadcast %1 : vector<1x96xf32> to vector<16x96xf32>
    %12 = arith.addf %10, %11 : vector<16x96xf32>
    %13 = tpu.iota {dimensions = array<i32: 0>} : vector<16x16xi32>
    %14 = tpu.iota {dimensions = array<i32: 1>} : vector<16x16xi32>
    %c2_i32 = arith.constant 2 : i32
    %c0_i32 = arith.constant 0 : i32
    %15 = arith.cmpi eq, %c2_i32, %c0_i32 : i32
    %c1_i32 = arith.constant 1 : i32
    %16 = arith.select %15, %c1_i32, %c2_i32 : i32
    %17 = vector.broadcast %16 : i32 to vector<16x16xi32>
    %18 = arith.remsi %13, %17 : vector<16x16xi32>
    %c0_i32_12 = arith.constant 0 : i32
    %19 = vector.broadcast %c0_i32_12 : i32 to vector<16x16xi32>
    %20 = arith.cmpi ne, %18, %19 : vector<16x16xi32>
    %c0_i32_13 = arith.constant 0 : i32
    %21 = vector.broadcast %c0_i32_13 : i32 to vector<16x16xi32>
    %22 = arith.cmpi slt, %18, %21 : vector<16x16xi32>
    %c0_i32_14 = arith.constant 0 : i32
    %23 = arith.cmpi slt, %16, %c0_i32_14 : i32
    %24 = vector.broadcast %23 : i1 to vector<16x16xi1>
    %25 = vector.broadcast %24 : vector<16x16xi1> to vector<16x16xi1>
    %26 = arith.xori %22, %25 : vector<16x16xi1>
    %27 = arith.andi %26, %20 : vector<16x16xi1>
    %28 = vector.broadcast %16 : i32 to vector<16x16xi32>
    %29 = arith.addi %18, %28 : vector<16x16xi32>
    %30 = arith.select %27, %29, %18 : vector<16x16xi1>, vector<16x16xi32>
    %c2_i32_15 = arith.constant 2 : i32
    %c0_i32_16 = arith.constant 0 : i32
    %31 = arith.cmpi eq, %c2_i32_15, %c0_i32_16 : i32
    %c1_i32_17 = arith.constant 1 : i32
    %32 = arith.select %31, %c1_i32_17, %c2_i32_15 : i32
    %33 = vector.broadcast %32 : i32 to vector<16x16xi32>
    %34 = arith.remsi %14, %33 : vector<16x16xi32>
    %c0_i32_18 = arith.constant 0 : i32
    %35 = vector.broadcast %c0_i32_18 : i32 to vector<16x16xi32>
    %36 = arith.cmpi ne, %34, %35 : vector<16x16xi32>
    %c0_i32_19 = arith.constant 0 : i32
    %37 = vector.broadcast %c0_i32_19 : i32 to vector<16x16xi32>
    %38 = arith.cmpi slt, %34, %37 : vector<16x16xi32>
    %c0_i32_20 = arith.constant 0 : i32
    %39 = arith.cmpi slt, %32, %c0_i32_20 : i32
    %40 = vector.broadcast %39 : i1 to vector<16x16xi1>
    %41 = vector.broadcast %40 : vector<16x16xi1> to vector<16x16xi1>
    %42 = arith.xori %38, %41 : vector<16x16xi1>
    %43 = arith.andi %42, %36 : vector<16x16xi1>
    %44 = vector.broadcast %32 : i32 to vector<16x16xi32>
    %45 = arith.addi %34, %44 : vector<16x16xi32>
    %46 = arith.select %43, %45, %34 : vector<16x16xi1>, vector<16x16xi32>
    %47 = arith.cmpi eq, %30, %46 : vector<16x16xi32>
    %cst_21 = arith.constant 0.000000e+00 : f32
    %48 = vector.broadcast %cst_21 : f32 to vector<16x32xf32>
    %49 = vector.extract_strided_slice %12 {offsets = [0, 0], sizes = [16, 8], strides = [1, 1]} : vector<16x96xf32> to vector<16x8xf32>
    %50 = vector.extract_strided_slice %12 {offsets = [0, 32], sizes = [16, 8], strides = [1, 1]} : vector<16x96xf32> to vector<16x8xf32>
    %51 = vector.extract_strided_slice %12 {offsets = [0, 64], sizes = [16, 8], strides = [1, 1]} : vector<16x96xf32> to vector<16x8xf32>
    %cst_22 = arith.constant dense<0.000000e+00> : vector<16x16xf32>
    %52 = tpu.matmul %49, %50, %cst_22 {dimension_numbers = #tpu.dot_dimension_numbers<[1], [1], [0], [0], [0, 0, 1, 0], [], []>} : vector<16x8xf32>, vector<16x8xf32>, vector<16x16xf32> -> vector<16x16xf32>
    %cst_23 = arith.constant -1.000000e+30 : f32
    %53 = vector.broadcast %cst_23 : f32 to vector<16x16xf32>
    %54 = arith.select %47, %52, %53 : vector<16x16xi1>, vector<16x16xf32>
    %cst_24 = arith.constant dense<0xFF800000> : vector<16xf32>
    %55 = vector.multi_reduction <maximumf>, %54, %cst_24 [1] : vector<16x16xf32> to vector<16xf32>
    %56 = vector.shape_cast %55 : vector<16xf32> to vector<16x1xf32>
    %57 = vector.broadcast %56 : vector<16x1xf32> to vector<16x16xf32>
    %58 = arith.subf %54, %57 : vector<16x16xf32>
    %59 = math.exp %58 : vector<16x16xf32>
    %cst_25 = arith.constant dense<0.000000e+00> : vector<16xf32>
    %60 = vector.multi_reduction <add>, %59, %cst_25 [1] : vector<16x16xf32> to vector<16xf32>
    %61 = vector.shape_cast %60 : vector<16xf32> to vector<16x1xf32>
    %62 = tpu.reciprocal %61 {approx = true} : vector<16x1xf32> -> vector<16x1xf32>
    %63 = vector.broadcast %62 : vector<16x1xf32> to vector<16x16xf32>
    %64 = arith.mulf %59, %63 : vector<16x16xf32>
    %cst_26 = arith.constant dense<0.000000e+00> : vector<16x8xf32>
    %65 = tpu.matmul %64, %51, %cst_26 {dimension_numbers = #tpu.dot_dimension_numbers<[1], [0], [0], [1], [0, 0, 1, 1], [], []>} : vector<16x16xf32>, vector<16x8xf32>, vector<16x8xf32> -> vector<16x8xf32>
    %c0_27 = arith.constant 0 : index
    %c0_28 = arith.constant 0 : index
    %66 = vector.load %arg3[%c0_27, %c0_28] : memref<32x32xf32, #tpu.memory_space<vmem>>, vector<8x32xf32>
    %cst_29 = arith.constant dense<0.000000e+00> : vector<16x32xf32>
    %67 = tpu.matmul %65, %66, %cst_29 {dimension_numbers = #tpu.dot_dimension_numbers<[1], [0], [0], [1], [0, 0, 1, 1], [], []>} : vector<16x8xf32>, vector<8x32xf32>, vector<16x32xf32> -> vector<16x32xf32>
    %68 = arith.addf %48, %67 : vector<16x32xf32>
    %69 = vector.extract_strided_slice %12 {offsets = [0, 8], sizes = [16, 8], strides = [1, 1]} : vector<16x96xf32> to vector<16x8xf32>
    %70 = vector.extract_strided_slice %12 {offsets = [0, 40], sizes = [16, 8], strides = [1, 1]} : vector<16x96xf32> to vector<16x8xf32>
    %71 = vector.extract_strided_slice %12 {offsets = [0, 72], sizes = [16, 8], strides = [1, 1]} : vector<16x96xf32> to vector<16x8xf32>
    %cst_30 = arith.constant dense<0.000000e+00> : vector<16x16xf32>
    %72 = tpu.matmul %69, %70, %cst_30 {dimension_numbers = #tpu.dot_dimension_numbers<[1], [1], [0], [0], [0, 0, 1, 0], [], []>} : vector<16x8xf32>, vector<16x8xf32>, vector<16x16xf32> -> vector<16x16xf32>
    %cst_31 = arith.constant -1.000000e+30 : f32
    %73 = vector.broadcast %cst_31 : f32 to vector<16x16xf32>
    %74 = arith.select %47, %72, %73 : vector<16x16xi1>, vector<16x16xf32>
    %cst_32 = arith.constant dense<0xFF800000> : vector<16xf32>
    %75 = vector.multi_reduction <maximumf>, %74, %cst_32 [1] : vector<16x16xf32> to vector<16xf32>
    %76 = vector.shape_cast %75 : vector<16xf32> to vector<16x1xf32>
    %77 = vector.broadcast %76 : vector<16x1xf32> to vector<16x16xf32>
    %78 = arith.subf %74, %77 : vector<16x16xf32>
    %79 = math.exp %78 : vector<16x16xf32>
    %cst_33 = arith.constant dense<0.000000e+00> : vector<16xf32>
    %80 = vector.multi_reduction <add>, %79, %cst_33 [1] : vector<16x16xf32> to vector<16xf32>
    %81 = vector.shape_cast %80 : vector<16xf32> to vector<16x1xf32>
    %82 = tpu.reciprocal %81 {approx = true} : vector<16x1xf32> -> vector<16x1xf32>
    %83 = vector.broadcast %82 : vector<16x1xf32> to vector<16x16xf32>
    %84 = arith.mulf %79, %83 : vector<16x16xf32>
    %cst_34 = arith.constant dense<0.000000e+00> : vector<16x8xf32>
    %85 = tpu.matmul %84, %71, %cst_34 {dimension_numbers = #tpu.dot_dimension_numbers<[1], [0], [0], [1], [0, 0, 1, 1], [], []>} : vector<16x16xf32>, vector<16x8xf32>, vector<16x8xf32> -> vector<16x8xf32>
    %c8 = arith.constant 8 : index
    %c0_35 = arith.constant 0 : index
    %86 = vector.load %arg3[%c8, %c0_35] : memref<32x32xf32, #tpu.memory_space<vmem>>, vector<8x32xf32>
    %cst_36 = arith.constant dense<0.000000e+00> : vector<16x32xf32>
    %87 = tpu.matmul %85, %86, %cst_36 {dimension_numbers = #tpu.dot_dimension_numbers<[1], [0], [0], [1], [0, 0, 1, 1], [], []>} : vector<16x8xf32>, vector<8x32xf32>, vector<16x32xf32> -> vector<16x32xf32>
    %88 = arith.addf %68, %87 : vector<16x32xf32>
    %89 = vector.extract_strided_slice %12 {offsets = [0, 16], sizes = [16, 8], strides = [1, 1]} : vector<16x96xf32> to vector<16x8xf32>
    %90 = vector.extract_strided_slice %12 {offsets = [0, 48], sizes = [16, 8], strides = [1, 1]} : vector<16x96xf32> to vector<16x8xf32>
    %91 = vector.extract_strided_slice %12 {offsets = [0, 80], sizes = [16, 8], strides = [1, 1]} : vector<16x96xf32> to vector<16x8xf32>
    %cst_37 = arith.constant dense<0.000000e+00> : vector<16x16xf32>
    %92 = tpu.matmul %89, %90, %cst_37 {dimension_numbers = #tpu.dot_dimension_numbers<[1], [1], [0], [0], [0, 0, 1, 0], [], []>} : vector<16x8xf32>, vector<16x8xf32>, vector<16x16xf32> -> vector<16x16xf32>
    %cst_38 = arith.constant -1.000000e+30 : f32
    %93 = vector.broadcast %cst_38 : f32 to vector<16x16xf32>
    %94 = arith.select %47, %92, %93 : vector<16x16xi1>, vector<16x16xf32>
    %cst_39 = arith.constant dense<0xFF800000> : vector<16xf32>
    %95 = vector.multi_reduction <maximumf>, %94, %cst_39 [1] : vector<16x16xf32> to vector<16xf32>
    %96 = vector.shape_cast %95 : vector<16xf32> to vector<16x1xf32>
    %97 = vector.broadcast %96 : vector<16x1xf32> to vector<16x16xf32>
    %98 = arith.subf %94, %97 : vector<16x16xf32>
    %99 = math.exp %98 : vector<16x16xf32>
    %cst_40 = arith.constant dense<0.000000e+00> : vector<16xf32>
    %100 = vector.multi_reduction <add>, %99, %cst_40 [1] : vector<16x16xf32> to vector<16xf32>
    %101 = vector.shape_cast %100 : vector<16xf32> to vector<16x1xf32>
    %102 = tpu.reciprocal %101 {approx = true} : vector<16x1xf32> -> vector<16x1xf32>
    %103 = vector.broadcast %102 : vector<16x1xf32> to vector<16x16xf32>
    %104 = arith.mulf %99, %103 : vector<16x16xf32>
    %cst_41 = arith.constant dense<0.000000e+00> : vector<16x8xf32>
    %105 = tpu.matmul %104, %91, %cst_41 {dimension_numbers = #tpu.dot_dimension_numbers<[1], [0], [0], [1], [0, 0, 1, 1], [], []>} : vector<16x16xf32>, vector<16x8xf32>, vector<16x8xf32> -> vector<16x8xf32>
    %c16 = arith.constant 16 : index
    %c0_42 = arith.constant 0 : index
    %106 = vector.load %arg3[%c16, %c0_42] : memref<32x32xf32, #tpu.memory_space<vmem>>, vector<8x32xf32>
    %cst_43 = arith.constant dense<0.000000e+00> : vector<16x32xf32>
    %107 = tpu.matmul %105, %106, %cst_43 {dimension_numbers = #tpu.dot_dimension_numbers<[1], [0], [0], [1], [0, 0, 1, 1], [], []>} : vector<16x8xf32>, vector<8x32xf32>, vector<16x32xf32> -> vector<16x32xf32>
    %108 = arith.addf %88, %107 : vector<16x32xf32>
    %109 = vector.extract_strided_slice %12 {offsets = [0, 24], sizes = [16, 8], strides = [1, 1]} : vector<16x96xf32> to vector<16x8xf32>
    %110 = vector.extract_strided_slice %12 {offsets = [0, 56], sizes = [16, 8], strides = [1, 1]} : vector<16x96xf32> to vector<16x8xf32>
    %111 = vector.extract_strided_slice %12 {offsets = [0, 88], sizes = [16, 8], strides = [1, 1]} : vector<16x96xf32> to vector<16x8xf32>
    %cst_44 = arith.constant dense<0.000000e+00> : vector<16x16xf32>
    %112 = tpu.matmul %109, %110, %cst_44 {dimension_numbers = #tpu.dot_dimension_numbers<[1], [1], [0], [0], [0, 0, 1, 0], [], []>} : vector<16x8xf32>, vector<16x8xf32>, vector<16x16xf32> -> vector<16x16xf32>
    %cst_45 = arith.constant -1.000000e+30 : f32
    %113 = vector.broadcast %cst_45 : f32 to vector<16x16xf32>
    %114 = arith.select %47, %112, %113 : vector<16x16xi1>, vector<16x16xf32>
    %cst_46 = arith.constant dense<0xFF800000> : vector<16xf32>
    %115 = vector.multi_reduction <maximumf>, %114, %cst_46 [1] : vector<16x16xf32> to vector<16xf32>
    %116 = vector.shape_cast %115 : vector<16xf32> to vector<16x1xf32>
    %117 = vector.broadcast %116 : vector<16x1xf32> to vector<16x16xf32>
    %118 = arith.subf %114, %117 : vector<16x16xf32>
    %119 = math.exp %118 : vector<16x16xf32>
    %cst_47 = arith.constant dense<0.000000e+00> : vector<16xf32>
    %120 = vector.multi_reduction <add>, %119, %cst_47 [1] : vector<16x16xf32> to vector<16xf32>
    %121 = vector.shape_cast %120 : vector<16xf32> to vector<16x1xf32>
    %122 = tpu.reciprocal %121 {approx = true} : vector<16x1xf32> -> vector<16x1xf32>
    %123 = vector.broadcast %122 : vector<16x1xf32> to vector<16x16xf32>
    %124 = arith.mulf %119, %123 : vector<16x16xf32>
    %cst_48 = arith.constant dense<0.000000e+00> : vector<16x8xf32>
    %125 = tpu.matmul %124, %111, %cst_48 {dimension_numbers = #tpu.dot_dimension_numbers<[1], [0], [0], [1], [0, 0, 1, 1], [], []>} : vector<16x16xf32>, vector<16x8xf32>, vector<16x8xf32> -> vector<16x8xf32>
    %c24 = arith.constant 24 : index
    %c0_49 = arith.constant 0 : index
    %126 = vector.load %arg3[%c24, %c0_49] : memref<32x32xf32, #tpu.memory_space<vmem>>, vector<8x32xf32>
    %cst_50 = arith.constant dense<0.000000e+00> : vector<16x32xf32>
    %127 = tpu.matmul %125, %126, %cst_50 {dimension_numbers = #tpu.dot_dimension_numbers<[1], [0], [0], [1], [0, 0, 1, 1], [], []>} : vector<16x8xf32>, vector<8x32xf32>, vector<16x32xf32> -> vector<16x32xf32>
    %128 = arith.addf %108, %127 : vector<16x32xf32>
    %129 = vector.broadcast %2 : vector<1x32xf32> to vector<16x32xf32>
    %130 = arith.addf %128, %129 : vector<16x32xf32>
    %131 = arith.addf %0, %130 : vector<16x32xf32>
    %cst_51 = arith.constant dense<0.000000e+00> : vector<16xf32>
    %132 = vector.multi_reduction <add>, %131, %cst_51 [1] : vector<16x32xf32> to vector<16xf32>
    %133 = vector.shape_cast %132 : vector<16xf32> to vector<16x1xf32>
    %cst_52 = arith.constant 3.200000e+01 : f32
    %134 = vector.broadcast %cst_52 : f32 to vector<16x1xf32>
    %135 = arith.divf %133, %134 : vector<16x1xf32>
    %136 = vector.broadcast %135 : vector<16x1xf32> to vector<16x32xf32>
    %137 = arith.subf %131, %136 : vector<16x32xf32>
    %138 = arith.mulf %137, %137 : vector<16x32xf32>
    %cst_53 = arith.constant dense<0.000000e+00> : vector<16xf32>
    %139 = vector.multi_reduction <add>, %138, %cst_53 [1] : vector<16x32xf32> to vector<16xf32>
    %140 = vector.shape_cast %139 : vector<16xf32> to vector<16x1xf32>
    %cst_54 = arith.constant 3.200000e+01 : f32
    %141 = vector.broadcast %cst_54 : f32 to vector<16x1xf32>
    %142 = arith.divf %140, %141 : vector<16x1xf32>
    %cst_55 = arith.constant 9.99999974E-6 : f32
    %143 = vector.broadcast %cst_55 : f32 to vector<16x1xf32>
    %144 = arith.addf %142, %143 : vector<16x1xf32>
    %145 = math.rsqrt %144 : vector<16x1xf32>
    %146 = vector.broadcast %145 : vector<16x1xf32> to vector<16x32xf32>
    %147 = arith.mulf %137, %146 : vector<16x32xf32>
    %148 = vector.broadcast %3 : vector<1x32xf32> to vector<16x32xf32>
    %149 = arith.mulf %147, %148 : vector<16x32xf32>
    %150 = vector.broadcast %4 : vector<1x32xf32> to vector<16x32xf32>
    %151 = arith.addf %149, %150 : vector<16x32xf32>
    %c0_56 = arith.constant 0 : index
    %c0_57 = arith.constant 0 : index
    %152 = vector.load %arg4[%c0_56, %c0_57] : memref<32x64xf32, #tpu.memory_space<vmem>>, vector<32x64xf32>
    %cst_58 = arith.constant dense<0.000000e+00> : vector<16x64xf32>
    %153 = tpu.matmul %151, %152, %cst_58 {dimension_numbers = #tpu.dot_dimension_numbers<[1], [0], [0], [1], [0, 0, 1, 1], [], []>} : vector<16x32xf32>, vector<32x64xf32>, vector<16x64xf32> -> vector<16x64xf32>
    %154 = vector.broadcast %5 : vector<1x64xf32> to vector<16x64xf32>
    %155 = arith.addf %153, %154 : vector<16x64xf32>
    %cst_59 = arith.constant 0.000000e+00 : f32
    %156 = vector.broadcast %cst_59 : f32 to vector<16x64xf32>
    %157 = arith.maximumf %155, %156 : vector<16x64xf32>
    %c0_60 = arith.constant 0 : index
    %c0_61 = arith.constant 0 : index
    %158 = vector.load %arg5[%c0_60, %c0_61] : memref<64x32xf32, #tpu.memory_space<vmem>>, vector<64x32xf32>
    %cst_62 = arith.constant dense<0.000000e+00> : vector<16x32xf32>
    %159 = tpu.matmul %157, %158, %cst_62 {dimension_numbers = #tpu.dot_dimension_numbers<[1], [0], [0], [1], [0, 0, 1, 1], [], []>} : vector<16x64xf32>, vector<64x32xf32>, vector<16x32xf32> -> vector<16x32xf32>
    %160 = vector.broadcast %6 : vector<1x32xf32> to vector<16x32xf32>
    %161 = arith.addf %159, %160 : vector<16x32xf32>
    %162 = arith.addf %151, %161 : vector<16x32xf32>
    %cst_63 = arith.constant dense<0.000000e+00> : vector<16xf32>
    %163 = vector.multi_reduction <add>, %162, %cst_63 [1] : vector<16x32xf32> to vector<16xf32>
    %164 = vector.shape_cast %163 : vector<16xf32> to vector<16x1xf32>
    %cst_64 = arith.constant 3.200000e+01 : f32
    %165 = vector.broadcast %cst_64 : f32 to vector<16x1xf32>
    %166 = arith.divf %164, %165 : vector<16x1xf32>
    %167 = vector.broadcast %166 : vector<16x1xf32> to vector<16x32xf32>
    %168 = arith.subf %162, %167 : vector<16x32xf32>
    %169 = arith.mulf %168, %168 : vector<16x32xf32>
    %cst_65 = arith.constant dense<0.000000e+00> : vector<16xf32>
    %170 = vector.multi_reduction <add>, %169, %cst_65 [1] : vector<16x32xf32> to vector<16xf32>
    %171 = vector.shape_cast %170 : vector<16xf32> to vector<16x1xf32>
    %cst_66 = arith.constant 3.200000e+01 : f32
    %172 = vector.broadcast %cst_66 : f32 to vector<16x1xf32>
    %173 = arith.divf %171, %172 : vector<16x1xf32>
    %cst_67 = arith.constant 9.99999974E-6 : f32
    %174 = vector.broadcast %cst_67 : f32 to vector<16x1xf32>
    %175 = arith.addf %173, %174 : vector<16x1xf32>
    %176 = math.rsqrt %175 : vector<16x1xf32>
    %177 = vector.broadcast %176 : vector<16x1xf32> to vector<16x32xf32>
    %178 = arith.mulf %168, %177 : vector<16x32xf32>
    %179 = vector.broadcast %7 : vector<1x32xf32> to vector<16x32xf32>
    %180 = arith.mulf %178, %179 : vector<16x32xf32>
    %181 = vector.broadcast %8 : vector<1x32xf32> to vector<16x32xf32>
    %182 = arith.addf %180, %181 : vector<16x32xf32>
    %c0_68 = arith.constant 0 : index
    %c0_69 = arith.constant 0 : index
    %183 = vector.load %arg7[%c0_68, %c0_69] : memref<16x32xf32, #tpu.memory_space<vmem>>, vector<16x32xf32>
    tpu.vector_store %arg7[%c0_68, %c0_69], %182 {strides = array<i32>} : memref<16x32xf32, #tpu.memory_space<vmem>>, vector<16x32xf32>,
    return
  }
  func.func @transform_0(%arg0: i32) -> (i32, i32) {
    %c0_i32 = arith.constant 0 : i32
    %c0_i32_0 = arith.constant 0 : i32
    %c0_i32_1 = arith.constant 0 : i32
    return %c0_i32, %c0_i32_0 : i32, i32
  }
  func.func @transform_1(%arg0: i32) -> (i32, i32) {
    %c0_i32 = arith.constant 0 : i32
    %c0_i32_0 = arith.constant 0 : i32
    %c0_i32_1 = arith.constant 0 : i32
    return %c0_i32, %c0_i32_0 : i32, i32
  }
  func.func @transform_2(%arg0: i32) -> (i32, i32) {
    %c0_i32 = arith.constant 0 : i32
    %c0_i32_0 = arith.constant 0 : i32
    %c0_i32_1 = arith.constant 0 : i32
    return %c0_i32, %c0_i32_0 : i32, i32
  }
  func.func @transform_3(%arg0: i32) -> (i32, i32) {
    %c0_i32 = arith.constant 0 : i32
    %c0_i32_0 = arith.constant 0 : i32
    %c0_i32_1 = arith.constant 0 : i32
    return %c0_i32, %c0_i32_0 : i32, i32
  }
  func.func @transform_4(%arg0: i32) -> (i32, i32) {
    %c0_i32 = arith.constant 0 : i32
    %c0_i32_0 = arith.constant 0 : i32
    %c0_i32_1 = arith.constant 0 : i32
    return %c0_i32, %c0_i32_0 : i32, i32
  }
  func.func @transform_5(%arg0: i32) -> (i32, i32) {
    %c0_i32 = arith.constant 0 : i32
    %c0_i32_0 = arith.constant 0 : i32
    %c0_i32_1 = arith.constant 0 : i32
    return %c0_i32, %c0_i32_0 : i32, i32
  }
  func.func @transform_6(%arg0: i32) -> (i32, i32) {
    %c0_i32 = arith.constant 0 : i32
    %c0_i32_0 = arith.constant 0 : i32
    %c0_i32_1 = arith.constant 0 : i32
    return %c0_i32, %c0_i32_0 : i32, i32
  }
}

</mosaic_0001>

<bundles_post_ra>
// kernel: tpu_custom_call.1
= control target key start
LH: loop header
LB: loop body
LE: loop exit
PB: predicated region body
PF: predicated region fallthrough
CT: control target
= control target key end

     0   :  { %11 = vsyncpa [#allocation3], 0  ;;  %s2224_s0 = inlined_call_operand.hbm [shape: f32[16,32], index: 0, kind: input, shape index: {}]   ;;  %s2225_s1 = inlined_call_operand.vmem [shape: f32[32,96], index: 1, kind: input, shape index: {}]   ;;  %s2226_s2 = inlined_call_operand.vmem [shape: f32[32,32], index: 2, kind: input, shape index: {}]   ;;  %s2227_s3 = inlined_call_operand.vmem [shape: f32[32,64], index: 3, kind: input, shape index: {}]   ;;  %s2228_s4 = inlined_call_operand.vmem [shape: f32[64,32], index: 4, kind: input, shape index: {}]   ;;  %s2229_s5 = inlined_call_operand.vmem [shape: f32[8,128], index: 5, kind: input, shape index: {}]   ;;  %s2230_s6 = inlined_call_operand.hbm [shape: f32[16,32], index: 6, kind: output, shape index: {}]  }
   0x1   :  { %12 = vsyncpa [#allocation4], 0  ;;  %s1940_s21 = smov [#allocation2]  }
   0x2   :  { %s18_s22 = sshll.u32 %s1940_s21, 4  ;;  %s19_s22 = int_to_ptr.vmem [resolvable:$true] %s18_s22 }
   0x3   :  { %s1904_s23 = scalar_lea.vmem %s19_s22, 256  ;;  %p1909_p1 = scmp.lt.s32.totalorder %s19_s22, %s19_s22 }
   0x4   :  { %p1905_p0 = scmp.ne.s32.totalorder %s19_s22, %s1904_s23  ;;  %p1910_p2 = scmp.lt.s32.totalorder %s1904_s23, %s1904_s23 }
   0x6   :  { %p1911_p3 = por %p1910_p2, %p1909_p1 }
   0x8   :  { %p1912_p4 = pnand %p1911_p3, %p1905_p0 }
   0xa   :  { %1915 = shalt.err (!%p1912_p4)
}
   0xb   :  { %s1941_s24 = smov 128   ;;  %s1942_s25 = smov 8  }
   0xc   :  { %24 = dma.hbm_to_vmem [thread:$0]  %s2224_s0, 256, %s19_s22, [#allocation3], %s1941_s24, %s1941_s24, %s1942_s25  }
   0xd   :  { %1936 = dma.done.wait [#allocation3], 256  }
   0xe   :  { %1937 = vsyncadd [#allocation3], 4294967040  ;;  %vm56_vm0 = vcmask 261120   ;;  %v51_v0 = vld [vmem:[%s2225_s1 + $0x18] sm:$0xff]  ;;  %v50_v1 = vld [vmem:[%s2225_s1 + $0x10] sm:$0xff]  ;;  %vm187_vm1 = vcmask 64512   ;;  %v138_v17 = vlaneseq }
   0xf   :  { %1724 = vmatprep.subr.mxu0 %v51_v0  ;;  %v2002_v2 = vld [vmem:[#allocation2] sm:$0xff]  ;;  %v49_v3 = vld [vmem:[%s2225_s1 + $0x8] sm:$0xff]  ;;  %s1944_s13 = smov 96   ;;  %s1945_s14 = smov 120   ;;  %vm273_vm3 = vcmask 130048   ;;  %vm1471_vm5 = vcmask 523264  }
  0x10   :  { %1725 = vmatpush3.msra.mxu0 %v51_v0  ;;  %1732 = vmatprep.mubr.msk.f32.mxu0 %vm56_vm0, %v2002_v2  ;;  %v48_v4 = vld [vmem:[%s2225_s1] sm:$0xff]  ;;  %v2012_v5 = vld [vmem:[#allocation2 + $0x8] sm:$0xff]  ;;  %s1943_s1 = smov 88   ;;  %v139_v18 = vshrl.u32 %v138_v17, 7  ;;  %v142_v20 = vand.u32 127, %v138_v17  ;;  %s1946_s15 = smov 64  }
  0x11   :  { %1726 = vmatprep.subr.mxu0 %v50_v1  ;;  %v1612_v6 = vld [vmem:[%s2229_s5] ss:$0 sm:$0xff]  ;;  %s1947_s16 = smov 56   ;;  %s1948_s17 = smov 80  }
  0x12   :  { %1727 = vmatpush3.msra.mxu0 %v50_v1  ;;  %v140_v19 = vadd.s32 8, %v139_v18  ;;  %v171_v22 = vand.u32 1, %v142_v20  ;;  %v147_v23 = vand.u32 1, %v139_v18  ;;  %s1949_s18 = smov 112   ;;  %s1950_s19 = smov 72  }
  0x13   :  { %1728 = vmatprep.subr.mxu0 %v49_v3  ;;  %s1951_s20 = smov 104   ;;  %s1952_s27 = smov 48  }
  0x14   :  { %1729 = vmatpush3.msra.mxu0 %v49_v3  ;;  %v154_v21 = vand.u32 1, %v140_v19  ;;  %vm2047_vm4 = vcmp.eq.s32.totalorder %v147_v23, %v171_v22  ;;  %s1953_s28 = smov 40  }
  0x15   :  { %1730 = vmatprep.subr.mxu0 %v48_v4 }
  0x16   :  { %1731 = vmatpush3.msra.mxu0 %v48_v4  ;;  %vm2043_vm2 = vcmp.eq.s32.totalorder %v154_v21, %v171_v22 }
  0x17   :  { %1733 = vmatmul.mubr.msk.f32.vlgmr.msra.gmra.mxu0 %vm56_vm0, %v2012_v5 }
  0xd7   :  { %v1734_v7 = vpop.f32.mrf.mxu0 }
  0xd8   :  { %v2019_v8 = vadd.f32 %v1734_v7, %v1612_v6 }
  0xd9   :  { %v129_v9 = vpop.f32.mrf.mxu0 }
  0xda   :  { %v2021_v10 = vadd.f32 %v1612_v6, %v129_v9  ;;  %390 = vrot.lane.b32.xlu1 %v2019_v8, %s1943_s1  ;;  %185 = vrot.lane.b32.xlu0 %v2019_v8, %s1944_s13 }
  0xdc   :  { %1739 = vmatprep.mubr.msk.f32.mxu1 %vm187_vm1, %v2021_v10 }
  0xde   :  { %388 = vrot.lane.b32.xlu1 %v2021_v10, %s1943_s1  ;;  %183 = vrot.lane.b32.xlu0 %v2021_v10, %s1944_s13 }
  0xe2   :  { %386 = vrot.lane.b32.xlu1 %v2019_v8, %s1945_s14  ;;  %384 = vrot.lane.b32.xlu0 %v2021_v10, %s1945_s14 }
 0x14c   :  { %v186_v11 = vpop.permute.xlu0 %185  ;;  %v391_v12 = vpop.permute.xlu1 %390 }
 0x14d   :  { %1735 = vmatprep.subr.msk.mxu1 %vm187_vm1, %v186_v11 }
 0x14e   :  { %1736 = vmatpush3.xpose.msk.msra.mxu1 %vm187_vm1, %v186_v11 }
 0x150   :  { %v184_v13 = vpop.permute.xlu0 %183  ;;  %v389_v15 = vpop.permute.xlu1 %388 }
 0x151   :  { %1737 = vmatprep.subr.msk.mxu1 %vm187_vm1, %v184_v13 }
 0x152   :  { %1738 = vmatpush3.xpose.msk.msra.mxu1 %vm187_vm1, %v184_v13 }
 0x153   :  { %1749 = vmatprep.subr.msk.mxu1 %vm187_vm1, %v391_v12 }
 0x154   :  { %v385_v14 = vpop.permute.xlu0 %384  ;;  %v387_v16 = vpop.permute.xlu1 %386 }
 0x155   :  { %1740 = vmatmul.mubr.msk.f32.vlgmr.msra.gmra.mxu1 %vm187_vm1, %v2019_v8 }
 0x156   :  { %1750 = vmatpush3.xpose.msk.msra.mxu1 %vm187_vm1, %v391_v12  ;;  %1753 = vmatprep.mubr.msk.f32.mxu1 %vm187_vm1, %v385_v14  ;;  %v586_v14 = vld [vmem:[%s2226_s2 + $0x8] sm:$0xff] }
 0x157   :  { %1751 = vmatprep.subr.msk.mxu1 %vm187_vm1, %v389_v15 }
 0x15a   :  { %1752 = vmatpush3.xpose.msk.msra.mxu1 %vm187_vm1, %v389_v15  ;;  %v383_v15 = vld [vmem:[%s2226_s2] sm:$0xff] }
 0x15d   :  { %1754 = vmatmul.mubr.msk.f32.vlgmr.msra.gmra.mxu1 %vm187_vm1, %v387_v16 }
 0x215   :  { %v1741_v25 = vpop.f32.mrf.mxu1 }
 0x216   :  { %v272_v27 = vsel %vm2043_vm2, %v1741_v25, -1e+30 }
 0x217   :  { %v262_v28 = vpop.f32.mrf.mxu1  ;;  %v277_v29 = vsel %vm273_vm3, %v272_v27, -inf }
 0x218   :  { %v271_v30 = vsel %vm2047_vm4, %v262_v28, -1e+30  ;;  %278 = vmax.xlane.f32.xlu1 %v277_v29 }
 0x219   :  { %v274_v31 = vsel %vm273_vm3, %v271_v30, -inf }
 0x21a   :  { %275 = vmax.xlane.f32.xlu0 %v274_v31 }
 0x21d   :  { %v1755_v32 = vpop.f32.mrf.mxu1 }
 0x21e   :  { %v476_v36 = vsel %vm2043_vm2, %v1755_v32, -1e+30 }
 0x21f   :  { %v466_v33 = vpop.f32.mrf.mxu1  ;;  %v480_v37 = vsel %vm273_vm3, %v476_v36, -inf }
 0x220   :  { %v475_v34 = vsel %vm2047_vm4, %v466_v33, -1e+30 }
 0x221   :  { %v477_v35 = vsel %vm273_vm3, %v475_v34, -inf }
 0x222   :  { %478 = vmax.xlane.f32.xlu0 %v477_v35 }
 0x226   :  { %481 = vmax.xlane.f32.xlu0 %v480_v37 }
 0x229   :  { %298 = vrot.lane.b32.xlu1 %v2019_v8, %s1946_s15 }
 0x2a1   :  { %v279_v38 = vpop.xlane.xlu1 %278 }
 0x2a2   :  { %v281_v39 = vsub.f32 %v272_v27, %v279_v38 }
 0x2a3   :  { %v276_v40 = vpop.xlane.xlu0 %275 }
 0x2a4   :  { %v284_v41 = vmul.f32 1.442695, %v281_v39  ;;  %v280_v42 = vsub.f32 %v271_v30, %v276_v40 }
 0x2a5   :  { %v299_v43 = vpop.permute.xlu1 %298 }
 0x2a6   :  { %1856 = vpow2.f32 %v284_v41  ;;  %v282_v44 = vmul.f32 1.442695, %v280_v42  ;;  %1742 = vmatprep.subr.mxu0 %v299_v43 }
 0x2a7   :  { %1743 = vmatpush3.msra.mxu0 %v299_v43 }
 0x2a8   :  { %1858 = vpow2.f32 %v282_v44 }
 0x2ab   :  { %v479_v45 = vpop.xlane.xlu0 %478 }
 0x2ac   :  { %v483_v55 = vsub.f32 %v475_v34, %v479_v45 }
 0x2ae   :  { %v485_v56 = vmul.f32 1.442695, %v483_v55 }
 0x2af   :  { %v482_v46 = vpop.xlane.xlu0 %481 }
 0x2b0   :  { %v484_v47 = vsub.f32 %v476_v36, %v482_v46 }
 0x2b2   :  { %v487_v48 = vmul.f32 1.442695, %v484_v47 }
 0x2b3   :  { %v1857_v49 = vpop.eup %1856 }
 0x2b4   :  { %1860 = vpow2.f32 %v487_v48  ;;  %v289_v50 = vsel %vm273_vm3, %v1857_v49, 0.0 }
 0x2b5   :  { %v1859_v51 = vpop.eup %1858  ;;  %290 = vadd.xlane.f32.xlu0 %v289_v50  ;;  %1862 = vpow2.f32 %v485_v56 }
 0x2b6   :  { %v286_v52 = vsel %vm273_vm3, %v1859_v51, 0.0 }
 0x2b7   :  { %287 = vadd.xlane.f32.xlu1 %v286_v52 }
 0x2c1   :  { %v1861_v53 = vpop.eup %1860 }
 0x2c2   :  { %v492_v54 = vsel %vm273_vm3, %v1861_v53, 0.0  ;;  %v1863_v57 = vpop.eup %1862 }
 0x2c3   :  { %493 = vadd.xlane.f32.xlu0 %v492_v54  ;;  %v489_v58 = vsel %vm273_vm3, %v1863_v57, 0.0 }
 0x2c8   :  { %501 = vrot.lane.b32.xlu1 %v2019_v8, %s1947_s16 }
 0x2d9   :  { %296 = vrot.lane.b32.xlu0 %v2021_v10, %s1946_s15 }
 0x2dd   :  { %755 = vrot.lane.b32.xlu0 %v2019_v8, %s1948_s17 }
 0x2e1   :  { %749 = vrot.lane.b32.xlu0 %v2021_v10, %s1949_s18 }
 0x2e5   :  { %1041 = vrot.lane.b32.xlu0 %v2019_v8, %s1950_s19 }
 0x2e9   :  { %1035 = vrot.lane.b32.xlu0 %v2021_v10, %s1951_s20 }
 0x2ec   :  { %490 = vadd.xlane.f32.xlu1 %v489_v58 }
 0x2fd   :  { %499 = vrot.lane.b32.xlu1 %v2021_v10, %s1947_s16 }
 0x301   :  { %753 = vrot.lane.b32.xlu1 %v2021_v10, %s1948_s17  ;;  %s1954_s17 = smov [#allocation5]  }
 0x305   :  { %751 = vrot.lane.b32.xlu1 %v2019_v8, %s1949_s18  ;;  %s1600_s18 = sshll.u32 %s1954_s17, 4  ;;  %s1601_s18 = int_to_ptr.vmem [resolvable:$true] %s1600_s18 }
 0x306   :  { %p1921_p6 = scmp.lt.s32.totalorder %s1601_s18, %s1601_s18 }
 0x309   :  { %1039 = vrot.lane.b32.xlu1 %v2021_v10, %s1950_s19  ;;  %s1916_s19 = scalar_lea.vmem %s1601_s18, 256 }
 0x30a   :  { %p1917_p5 = scmp.ne.s32.totalorder %s1601_s18, %s1916_s19  ;;  %p1922_p7 = scmp.lt.s32.totalorder %s1916_s19, %s1916_s19 }
 0x30c   :  { %p1923_p8 = por %p1922_p7, %p1921_p6 }
 0x30d   :  { %1037 = vrot.lane.b32.xlu1 %v2019_v8, %s1951_s20 }
 0x30e   :  { %p1924_p9 = pnand %p1923_p8, %p1917_p5 }
 0x33e   :  { %v291_v59 = vpop.xlane.xlu0 %290 }
 0x33f   :  { %1864 = vrcp.f32 %v291_v59 }
 0x340   :  { %v288_v60 = vpop.xlane.xlu1 %287 }
 0x341   :  { %1866 = vrcp.f32 %v288_v60 }
 0x344   :  { %v502_v4 = vpop.permute.xlu1 %501 }
 0x34c   :  { %v494_v61 = vpop.xlane.xlu0 %493  ;;  %v1865_v62 = vpop.eup %1864 }
 0x34d   :  { %v295_v3 = vmul.f32 %v1865_v62, %v1857_v49  ;;  %1868 = vrcp.f32 %v494_v61 }
 0x34e   :  { %v1867_v63 = vpop.eup %1866 }
 0x34f   :  { %v294_v0 = vmul.f32 %v1867_v63, %v1859_v51 }
 0x350   :  { %v297_v1 = vpop.permute.xlu0 %296 }
 0x351   :  { %1744 = vmatprep.subr.mxu0 %v297_v1  ;;  %1746 = vmatprep.mubr.msk.f32.mxu0 %vm273_vm3, %v294_v0 }
 0x352   :  { %1745 = vmatpush3.msra.mxu0 %v297_v1 }
 0x353   :  { %1747 = vmatmul.mubr.msk.f32.vlgmr.msra.gmra.mxu0 %vm273_vm3, %v295_v3  ;;  %1756 = vmatprep.subr.mxu0 %v502_v4  ;;  %v951_v3 = vld [vmem:[%s2226_s2 + $0x10] sm:$0xff] }
 0x354   :  { %1757 = vmatpush3.msra.mxu0 %v502_v4  ;;  %v756_v17 = vpop.permute.xlu0 %755 }
 0x358   :  { %v750_v21 = vpop.permute.xlu0 %749 }
 0x35a   :  { %v1869_v9 = vpop.eup %1868 }
 0x35b   :  { %v498_v13 = vmul.f32 %v1869_v9, %v1861_v53 }
 0x35c   :  { %v1042_v23 = vpop.permute.xlu0 %1041 }
 0x360   :  { %v1036_v27 = vpop.permute.xlu0 %1035 }
 0x375   :  { %v491_v6 = vpop.xlane.xlu1 %490 }
 0x376   :  { %1870 = vrcp.f32 %v491_v6 }
 0x379   :  { %v500_v7 = vpop.permute.xlu1 %499 }
 0x37a   :  { %1758 = vmatprep.subr.mxu0 %v500_v7 }
 0x37b   :  { %1759 = vmatpush3.msra.mxu0 %v500_v7 }
 0x37c   :  { %1763 = vmatprep.subr.mxu0 %v586_v14 }
 0x37d   :  { %v754_v22 = vpop.permute.xlu1 %753 }
 0x381   :  { %v752_v25 = vpop.permute.xlu1 %751 }
 0x383   :  { %v1871_v11 = vpop.eup %1870 }
 0x384   :  { %v497_v12 = vmul.f32 %v1871_v11, %v1863_v57 }
 0x385   :  { %v1040_v28 = vpop.permute.xlu1 %1039 }
 0x386   :  { %1760 = vmatprep.mubr.msk.f32.mxu0 %vm273_vm3, %v497_v12 }
 0x387   :  { %1761 = vmatmul.mubr.msk.f32.vlgmr.msra.gmra.mxu0 %vm273_vm3, %v498_v13 }
 0x388   :  { %1764 = vmatpush3.msra.mxu0 %v586_v14 }
 0x389   :  { %1768 = vmatprep.subr.mxu0 %v383_v15  ;;  %v1038_v29 = vpop.permute.xlu1 %1037 }
 0x413   :  { %v1748_v16 = vpop.f32.mrf.mxu0 }
 0x415   :  { %v374_v18 = vpop.f32.mrf.mxu0 }
 0x447   :  { %v1762_v19 = vpop.f32.mrf.mxu0 }
 0x449   :  { %v577_v20 = vpop.f32.mrf.mxu0 }
 0x44a   :  { %1765 = vmatprep.mubr.msk.f32.mxu0 %vm187_vm1, %v577_v20 }
 0x44b   :  { %1766 = vmatmul.mubr.msk.f32.vlgmr.msra.gmra.mxu0 %vm187_vm1, %v1762_v19 }
 0x44c   :  { %1769 = vmatpush3.msra.mxu0 %v383_v15  ;;  %1770 = vmatprep.mubr.msk.f32.mxu0 %vm187_vm1, %v374_v18 }
 0x44d   :  { %1773 = vmatprep.subr.msk.mxu0 %vm187_vm1, %v756_v17 }
 0x44f   :  { %1771 = vmatmul.mubr.msk.f32.vlgmr.msra.gmra.mxu0 %vm187_vm1, %v1748_v16 }
 0x450   :  { %1774 = vmatpush3.xpose.msk.msra.mxu0 %vm187_vm1, %v756_v17  ;;  %1777 = vmatprep.mubr.msk.f32.mxu0 %vm187_vm1, %v750_v21 }
 0x451   :  { %1775 = vmatprep.subr.msk.mxu0 %vm187_vm1, %v754_v22 }
 0x454   :  { %1776 = vmatpush3.xpose.msk.msra.mxu0 %vm187_vm1, %v754_v22 }
 0x455   :  { %1792 = vmatprep.subr.msk.mxu0 %vm187_vm1, %v1042_v23 }
 0x457   :  { %1778 = vmatmul.mubr.msk.f32.vlgmr.msra.gmra.mxu0 %vm187_vm1, %v752_v25 }
 0x458   :  { %1793 = vmatpush3.xpose.msk.msra.mxu0 %vm187_vm1, %v1042_v23  ;;  %1796 = vmatprep.mubr.msk.f32.mxu0 %vm187_vm1, %v1036_v27 }
 0x459   :  { %1794 = vmatprep.subr.msk.mxu0 %vm187_vm1, %v1040_v28 }
 0x45c   :  { %1795 = vmatpush3.xpose.msk.msra.mxu0 %vm187_vm1, %v1040_v28 }
 0x45f   :  { %1797 = vmatmul.mubr.msk.f32.vlgmr.msra.gmra.mxu0 %vm187_vm1, %v1038_v29 }
 0x50b   :  { %v1767_v30 = vpop.f32.mrf.mxu0 }
 0x50d   :  { %v659_v31 = vpop.f32.mrf.mxu0 }
 0x50f   :  { %v1772_v32 = vpop.f32.mrf.mxu0 }
 0x510   :  { %v2107_v33 = vadd.f32 %v1772_v32, %v1767_v30  ;;  %v1647_v32 = vld [vmem:[%s2229_s5 + $0x1] ss:$0 sm:$0xff] }
 0x511   :  { %v740_v34 = vpop.f32.mrf.mxu0 }
 0x512   :  { %v2109_v35 = vadd.f32 %v740_v34, %v659_v31 }
 0x517   :  { %v1779_v36 = vpop.f32.mrf.mxu0 }
 0x518   :  { %v841_v37 = vsel %vm2043_vm2, %v1779_v36, -1e+30 }
 0x519   :  { %v831_v38 = vpop.f32.mrf.mxu0  ;;  %v845_v39 = vsel %vm273_vm3, %v841_v37, -inf }
 0x51a   :  { %v840_v40 = vsel %vm2047_vm4, %v831_v38, -1e+30  ;;  %846 = vmax.xlane.f32.xlu1 %v845_v39 }
 0x51b   :  { %v842_v41 = vsel %vm273_vm3, %v840_v40, -inf }
 0x51c   :  { %843 = vmax.xlane.f32.xlu0 %v842_v41 }
 0x51f   :  { %v1798_v42 = vpop.f32.mrf.mxu0 }
 0x520   :  { %v1127_v61 = vsel %vm2043_vm2, %v1798_v42, -1e+30 }
 0x521   :  { %v1117_v43 = vpop.f32.mrf.mxu0  ;;  %v1131_v62 = vsel %vm273_vm3, %v1127_v61, -inf }
 0x522   :  { %v1126_v44 = vsel %vm2047_vm4, %v1117_v43, -1e+30 }
 0x523   :  { %v1128_v45 = vsel %vm273_vm3, %v1126_v44, -inf }
 0x52b   :  { %866 = vrot.lane.b32.xlu1 %v2019_v8, %s1952_s27 }
 0x54f   :  { %1129 = vmax.xlane.f32.xlu1 %v1128_v45 }
 0x5a3   :  { %v847_v46 = vpop.xlane.xlu1 %846 }
 0x5a4   :  { %v849_v47 = vsub.f32 %v841_v37, %v847_v46 }
 0x5a5   :  { %v844_v48 = vpop.xlane.xlu0 %843 }
 0x5a6   :  { %v852_v49 = vmul.f32 1.442695, %v849_v47  ;;  %v848_v50 = vsub.f32 %v840_v40, %v844_v48 }
 0x5a7   :  { %v867_v51 = vpop.permute.xlu1 %866 }
 0x5a8   :  { %1872 = vpow2.f32 %v852_v49  ;;  %v850_v52 = vmul.f32 1.442695, %v848_v50  ;;  %1780 = vmatprep.subr.mxu1 %v867_v51 }
 0x5a9   :  { %1781 = vmatpush3.msra.mxu1 %v867_v51 }
 0x5aa   :  { %1874 = vpow2.f32 %v850_v52  ;;  %v1370_v52 = vld [vmem:[%s2227_s3 + $0x10] sm:$0xff] }
 0x5b5   :  { %v1873_v53 = vpop.eup %1872 }
 0x5b6   :  { %v857_v54 = vsel %vm273_vm3, %v1873_v53, 0.0 }
 0x5b7   :  { %v1875_v55 = vpop.eup %1874  ;;  %858 = vadd.xlane.f32.xlu0 %v857_v54  ;;  %v1368_v54 = vld [vmem:[%s2227_s3] sm:$0xff] }
 0x5b8   :  { %v854_v26 = vsel %vm273_vm3, %v1875_v55, 0.0 }
 0x5bb   :  { %855 = vadd.xlane.f32.xlu0 %v854_v26  ;;  %v1465_v26 = vld [vmem:[%s2228_s4 + $0x30] sm:$0xff] }
 0x5d1   :  { %864 = vrot.lane.b32.xlu0 %v2021_v10, %s1952_s27 }
 0x5d8   :  { %v1130_v56 = vpop.xlane.xlu1 %1129 }
 0x5d9   :  { %v1134_v57 = vsub.f32 %v1126_v44, %v1130_v56  ;;  %v1464_v56 = vld [vmem:[%s2228_s4 + $0x28] sm:$0xff] }
 0x5db   :  { %v1136_v58 = vmul.f32 1.442695, %v1134_v57  ;;  %v1463_v57 = vld [vmem:[%s2228_s4 + $0x20] sm:$0xff] }
 0x5dd   :  { %1876 = vpow2.f32 %v1136_v58 }
 0x5ea   :  { %v1877_v59 = vpop.eup %1876 }
 0x5eb   :  { %v1140_v60 = vsel %vm273_vm3, %v1877_v59, 0.0 }
 0x5ec   :  { %1141 = vadd.xlane.f32.xlu1 %v1140_v60 }
 0x5f0   :  { %1132 = vmax.xlane.f32.xlu0 %v1131_v62 }
 0x5fd   :  { %1152 = vrot.lane.b32.xlu1 %v2019_v8, %s1953_s28 }
 0x640   :  { %v859_v63 = vpop.xlane.xlu0 %858 }
 0x641   :  { %1878 = vrcp.f32 %v859_v63 }
 0x644   :  { %v856_v0 = vpop.xlane.xlu0 %855 }
 0x645   :  { %1880 = vrcp.f32 %v856_v0 }
 0x648   :  { %v865_v1 = vpop.permute.xlu0 %864 }
 0x649   :  { %1782 = vmatprep.subr.mxu1 %v865_v1 }
 0x64a   :  { %1783 = vmatpush3.msra.mxu1 %v865_v1  ;;  %v1648_v1 = vld [vmem:[%s2229_s5 + $0x2] ss:$0 sm:$0xff] }
 0x64b   :  { %1787 = vmatprep.subr.mxu1 %v951_v3 }
 0x64e   :  { %v1879_v24 = vpop.eup %1878 }
 0x64f   :  { %v863_v7 = vmul.f32 %v1879_v24, %v1873_v53  ;;  %v1369_v53 = vld [vmem:[%s2227_s3 + $0x8] sm:$0xff] }
 0x652   :  { %v1881_v4 = vpop.eup %1880 }
 0x653   :  { %v862_v6 = vmul.f32 %v1881_v4, %v1875_v55  ;;  %v1466_v55 = vld [vmem:[%s2228_s4 + $0x38] sm:$0xff] }
 0x655   :  { %1784 = vmatprep.mubr.msk.f32.mxu1 %vm273_vm3, %v862_v6 }
 0x656   :  { %1785 = vmatmul.mubr.msk.f32.vlgmr.msra.gmra.mxu1 %vm273_vm3, %v863_v7  ;;  %v1649_v7 = vld [vmem:[%s2229_s5 + $0x3] ss:$0 sm:$0xff] }
 0x657   :  { %1788 = vmatpush3.msra.mxu1 %v951_v3 }
 0x675   :  { %v1142_v8 = vpop.xlane.xlu1 %1141 }
 0x679   :  { %v1153_v9 = vpop.permute.xlu1 %1152  ;;  %v1133_v11 = vpop.xlane.xlu0 %1132 }
 0x67a   :  { %v1135_v12 = vsub.f32 %v1127_v61, %v1133_v11  ;;  %1799 = vmatprep.subr.mxu1 %v1153_v9 }
 0x67c   :  { %v1138_v13 = vmul.f32 1.442695, %v1135_v12  ;;  %v1462_v12 = vld [vmem:[%s2228_s4 + $0x18] sm:$0xff] }
 0x67e   :  { %1882 = vpow2.f32 %v1138_v13  ;;  %v1461_v13 = vld [vmem:[%s2228_s4 + $0x10] sm:$0xff] }
 0x67f   :  { %1884 = vrcp.f32 %v1142_v8 }
 0x68b   :  { %v1883_v14 = vpop.eup %1882 }
 0x68c   :  { %v1143_v15 = vsel %vm273_vm3, %v1883_v14, 0.0  ;;  %v1885_v16 = vpop.eup %1884 }
 0x68d   :  { %1144 = vadd.xlane.f32.xlu0 %v1143_v15  ;;  %v1148_v20 = vmul.f32 %v1885_v16, %v1877_v59  ;;  %v1459_v15 = vld [vmem:[%s2228_s4] sm:$0xff] }
 0x68e   :  { %v1650_v16 = vld [vmem:[%s2229_s5 + $0x4] ss:$0 sm:$0xff] }
 0x6a3   :  { %1150 = vrot.lane.b32.xlu0 %v2021_v10, %s1953_s28  ;;  %v1237_v10 = vld [vmem:[%s2226_s2 + $0x18] sm:$0xff] }
 0x716   :  { %v1786_v17 = vpop.f32.mrf.mxu1  ;;  %v1145_v18 = vpop.xlane.xlu0 %1144 }
 0x717   :  { %1886 = vrcp.f32 %v1145_v18 }
 0x718   :  { %v942_v19 = vpop.f32.mrf.mxu1 }
 0x719   :  { %1789 = vmatprep.mubr.msk.f32.mxu1 %vm187_vm1, %v942_v19 }
 0x71a   :  { %1790 = vmatmul.mubr.msk.f32.vlgmr.msra.gmra.mxu1 %vm187_vm1, %v1786_v17  ;;  %v1151_v21 = vpop.permute.xlu0 %1150 }
 0x71b   :  { %1800 = vmatpush3.msra.mxu1 %v1153_v9  ;;  %1803 = vmatprep.mubr.msk.f32.mxu1 %vm273_vm3, %v1148_v20 }
 0x71c   :  { %1801 = vmatprep.subr.mxu1 %v1151_v21 }
 0x71d   :  { %1802 = vmatpush3.msra.mxu1 %v1151_v21 }
 0x71e   :  { %1806 = vmatprep.subr.mxu1 %v1237_v10 }
 0x724   :  { %v1887_v22 = vpop.eup %1886 }
 0x725   :  { %v1149_v23 = vmul.f32 %v1887_v22, %v1883_v14  ;;  %v1460_v14 = vld [vmem:[%s2228_s4 + $0x8] sm:$0xff] }
 0x727   :  { %1804 = vmatmul.mubr.msk.f32.vlgmr.msra.gmra.mxu1 %vm273_vm3, %v1149_v23  ;;  %v1653_v23 = vld [vmem:[%s2229_s5 + $0x5] ss:$0 sm:$0xff] }
 0x728   :  { %1807 = vmatpush3.msra.mxu1 %v1237_v10 }
 0x729   :  { %1822 = vmatprep.subr.mxu1 %v1466_v55 }
 0x7da   :  { %v1791_v25 = vpop.f32.mrf.mxu1 }
 0x7db   :  { %v1034_v27 = vadd.f32 %v1791_v25, %v2107_v33 }
 0x7dc   :  { %v1024_v28 = vpop.f32.mrf.mxu1 }
 0x7dd   :  { %v1033_v29 = vadd.f32 %v1024_v28, %v2109_v35 }
 0x7e7   :  { %v1805_v30 = vpop.f32.mrf.mxu1 }
 0x7e9   :  { %v1228_v31 = vpop.f32.mrf.mxu1 }
 0x7ea   :  { %1808 = vmatprep.mubr.msk.f32.mxu1 %vm187_vm1, %v1228_v31 }
 0x7eb   :  { %1809 = vmatmul.mubr.msk.f32.vlgmr.msra.gmra.mxu1 %vm187_vm1, %v1805_v30 }
 0x7ec   :  { %1823 = vmatpush3.msra.mxu1 %v1466_v55 }
 0x7ed   :  { %1824 = vmatprep.subr.mxu1 %v1465_v26 }
 0x7ee   :  { %1825 = vmatpush3.msra.mxu1 %v1465_v26 }
 0x7ef   :  { %1826 = vmatprep.subr.mxu1 %v1464_v56 }
 0x7f0   :  { %1827 = vmatpush3.msra.mxu1 %v1464_v56 }
 0x7f1   :  { %1828 = vmatprep.subr.mxu1 %v1463_v57 }
 0x7f2   :  { %1829 = vmatpush3.msra.mxu1 %v1463_v57 }
 0x7f3   :  { %1830 = vmatprep.subr.mxu1 %v1462_v12 }
 0x7f4   :  { %1831 = vmatpush3.msra.mxu1 %v1462_v12 }
 0x7f5   :  { %1832 = vmatprep.subr.mxu1 %v1461_v13 }
 0x7f6   :  { %1833 = vmatpush3.msra.mxu1 %v1461_v13 }
 0x7f7   :  { %1834 = vmatprep.subr.mxu1 %v1460_v14 }
 0x7f8   :  { %1835 = vmatpush3.msra.mxu1 %v1460_v14 }
 0x7f9   :  { %1836 = vmatprep.subr.mxu1 %v1459_v15 }
 0x7fa   :  { %1837 = vmatpush3.msra.mxu1 %v1459_v15 }
 0x8ab   :  { %v1810_v34 = vpop.f32.mrf.mxu1 }
 0x8ac   :  { %v1320_v36 = vadd.f32 %v1810_v34, %v1034_v27 }
 0x8ad   :  { %v1310_v37 = vpop.f32.mrf.mxu1 }
 0x8ae   :  { %v1326_v38 = vadd.f32 %v1647_v32, %v1320_v36  ;;  %v1319_v39 = vadd.f32 %v1310_v37, %v1033_v29 }
 0x8b0   :  { %v1325_v40 = vadd.f32 %v1647_v32, %v1319_v39  ;;  %v1328_v33 = vadd.f32 %v1326_v38, %v2012_v5 }
 0x8b2   :  { %v1332_v35 = vsel %vm56_vm0, %v1328_v33, 0.0  ;;  %v1327_v41 = vadd.f32 %v1325_v40, %v2002_v2  ;;  %v1371_v2 = vld [vmem:[%s2227_s3 + $0x18] sm:$0xff] }
 0x8b3   :  { %1333 = vadd.xlane.f32.xlu0 %v1332_v35  ;;  %1811 = vmatprep.subr.mxu0 %v1371_v2 }
 0x8b4   :  { %v1329_v42 = vsel %vm56_vm0, %v1327_v41, 0.0  ;;  %1812 = vmatpush3.msra.mxu0 %v1371_v2  ;;  %v1657_v2 = vld [vmem:[%s2229_s5 + $0x7] ss:$0 sm:$0xff] }
 0x8b5   :  { %1330 = vadd.xlane.f32.xlu1 %v1329_v42  ;;  %1813 = vmatprep.subr.mxu0 %v1370_v52 }
 0x8b6   :  { %1814 = vmatpush3.msra.mxu0 %v1370_v52 }
 0x8b7   :  { %1815 = vmatprep.subr.mxu0 %v1369_v53 }
 0x8b8   :  { %1816 = vmatpush3.msra.mxu0 %v1369_v53 }
 0x8b9   :  { %1817 = vmatprep.subr.mxu0 %v1368_v54 }
 0x8ba   :  { %1818 = vmatpush3.msra.mxu0 %v1368_v54 }
 0x93c   :  { %v1334_v43 = vpop.xlane.xlu0 %1333 }
 0x93d   :  { %v1337_v44 = vmul.f32 0.03125, %v1334_v43 }
 0x93e   :  { %v1331_v45 = vpop.xlane.xlu1 %1330 }
 0x93f   :  { %v1339_v46 = vsub.f32 %v1328_v33, %v1337_v44  ;;  %v1336_v47 = vmul.f32 0.03125, %v1331_v45 }
 0x941   :  { %v1338_v48 = vsub.f32 %v1327_v41, %v1336_v47  ;;  %v1341_v49 = vmul.f32 %v1339_v46, %v1339_v46 }
 0x943   :  { %v1345_v50 = vsel %vm56_vm0, %v1341_v49, 0.0  ;;  %v1340_v51 = vmul.f32 %v1338_v48, %v1338_v48 }
 0x944   :  { %1346 = vadd.xlane.f32.xlu0 %v1345_v50  ;;  %v1656_v50 = vld [vmem:[%s2229_s5 + $0x6] ss:$0 sm:$0xff] }
 0x945   :  { %v1342_v5 = vsel %vm56_vm0, %v1340_v51, 0.0 }
 0x946   :  { %1343 = vadd.xlane.f32.xlu1 %v1342_v5 }
 0x9cd   :  { %v1347_v58 = vpop.xlane.xlu0 %1346 }
 0x9ce   :  { %v1349_v59 = vmul.f32 0.03125, %v1347_v58 }
 0x9cf   :  { %v1344_v60 = vpop.xlane.xlu1 %1343 }
 0x9d0   :  { %v1351_v61 = vadd.f32 1e-05, %v1349_v59  ;;  %v1348_v62 = vmul.f32 0.03125, %v1344_v60 }
 0x9d2   :  { %1888 = vrsqrt.f32 %v1351_v61  ;;  %v1350_v63 = vadd.f32 1e-05, %v1348_v62 }
 0x9d4   :  { %1890 = vrsqrt.f32 %v1350_v63 }
 0x9df   :  { %v1889_v0 = vpop.eup %1888 }
 0x9e0   :  { %v1355_v3 = vmul.f32 %v1889_v0, %v1339_v46 }
 0x9e1   :  { %v1891_v24 = vpop.eup %1890 }
 0x9e2   :  { %v1354_v4 = vmul.f32 %v1891_v24, %v1338_v48  ;;  %v1361_v6 = vmul.f32 %v1648_v1, %v1355_v3 }
 0x9e4   :  { %v1360_v8 = vmul.f32 %v1648_v1, %v1354_v4  ;;  %v1367_v11 = vadd.f32 %v1649_v7, %v1361_v6 }
 0x9e6   :  { %v1366_v9 = vadd.f32 %v1649_v7, %v1360_v8 }
 0x9e8   :  { %1819 = vmatprep.mubr.msk.f32.mxu0 %vm56_vm0, %v1366_v9 }
 0x9e9   :  { %1820 = vmatmul.mubr.msk.f32.vlgmr.msra.gmra.mxu0 %vm56_vm0, %v1367_v11 }
 0xaa9   :  { %v1821_v17 = vpop.f32.mrf.mxu0 }
 0xaaa   :  { %v1454_v18 = vadd.f32 %v1821_v17, %v1650_v16 }
 0xaab   :  { %v1448_v19 = vpop.f32.mrf.mxu0 }
 0xaac   :  { %v1449_v20 = vadd.f32 %v1650_v16, %v1448_v19  ;;  %v1458_v22 = vmax.f32 %v1454_v18, 0.0 }
 0xaae   :  { %v1457_v21 = vmax.f32 %v1449_v20, 0.0 }
 0xab0   :  { %1838 = vmatprep.mubr.msk.f32.mxu1 %vm1471_vm5, %v1457_v21 }
 0xab1   :  { %1839 = vmatmul.mubr.msk.f32.vlgmr.msra.gmra.mxu1 %vm1471_vm5, %v1458_v22 }
 0xb71   :  { %v1840_v10 = vpop.f32.mrf.mxu1 }
 0xb72   :  { %v1550_v25 = vadd.f32 %v1840_v10, %v1653_v23 }
 0xb73   :  { %v1544_v27 = vpop.f32.mrf.mxu1 }
 0xb74   :  { %v1545_v28 = vadd.f32 %v1653_v23, %v1544_v27  ;;  %v1554_v29 = vadd.f32 %v1550_v25, %v1367_v11 }
 0xb76   :  { %v1558_v30 = vsel %vm56_vm0, %v1554_v29, 0.0  ;;  %v1553_v31 = vadd.f32 %v1545_v28, %v1366_v9 }
 0xb77   :  { %1559 = vadd.xlane.f32.xlu0 %v1558_v30 }
 0xb78   :  { %v1555_v32 = vsel %vm56_vm0, %v1553_v31, 0.0 }
 0xb79   :  { %1556 = vadd.xlane.f32.xlu1 %v1555_v32 }
 0xc00   :  { %v1560_v34 = vpop.xlane.xlu0 %1559 }
 0xc01   :  { %v1562_v36 = vmul.f32 0.03125, %v1560_v34 }
 0xc02   :  { %v1557_v37 = vpop.xlane.xlu1 %1556 }
 0xc03   :  { %v1564_v38 = vsub.f32 %v1554_v29, %v1562_v36  ;;  %v1561_v39 = vmul.f32 0.03125, %v1557_v37 }
 0xc05   :  { %v1563_v40 = vsub.f32 %v1553_v31, %v1561_v39  ;;  %v1566_v33 = vmul.f32 %v1564_v38, %v1564_v38 }
 0xc07   :  { %v1570_v35 = vsel %vm56_vm0, %v1566_v33, 0.0  ;;  %v1565_v41 = vmul.f32 %v1563_v40, %v1563_v40 }
 0xc08   :  { %1571 = vadd.xlane.f32.xlu0 %v1570_v35 }
 0xc09   :  { %v1567_v42 = vsel %vm56_vm0, %v1565_v41, 0.0 }
 0xc0a   :  { %1568 = vadd.xlane.f32.xlu1 %v1567_v42 }
 0xc91   :  { %v1572_v43 = vpop.xlane.xlu0 %1571 }
 0xc92   :  { %v1574_v44 = vmul.f32 0.03125, %v1572_v43 }
 0xc93   :  { %v1569_v45 = vpop.xlane.xlu1 %1568 }
 0xc94   :  { %v1576_v46 = vadd.f32 1e-05, %v1574_v44  ;;  %v1573_v47 = vmul.f32 0.03125, %v1569_v45 }
 0xc96   :  { %1892 = vrsqrt.f32 %v1576_v46  ;;  %v1575_v48 = vadd.f32 1e-05, %v1573_v47 }
 0xc98   :  { %1894 = vrsqrt.f32 %v1575_v48 }
 0xca3   :  { %v1893_v49 = vpop.eup %1892 }
 0xca4   :  { %v1580_v51 = vmul.f32 %v1893_v49, %v1564_v38 }
 0xca5   :  { %v1895_v5 = vpop.eup %1894 }
 0xca6   :  { %v1579_v52 = vmul.f32 %v1895_v5, %v1563_v40  ;;  %v1586_v53 = vmul.f32 %v1656_v50, %v1580_v51 }
 0xca8   :  { %v1585_v54 = vmul.f32 %v1656_v50, %v1579_v52  ;;  %v1592_v55 = vadd.f32 %v1657_v2, %v1586_v53 }
 0xcaa   :  { %v1591_v26 = vadd.f32 %v1657_v2, %v1585_v54  ;;  %1594 = vst.msk [vmem:[#allocation5 + $0x8] sm:$0xff] %vm56_vm0, %v1592_v55 }
 0xcac   :  { %1593 = vst.msk [vmem:[#allocation5] sm:$0xff] %vm56_vm0, %v1591_v26 }
 0xcad   :  { %1927 = shalt.err (!%p1924_p9)
}
 0xcae   :  { %1606 = dma.vmem_to_hbm [thread:$0]  %s1601_s18, 256, %s2230_s6, [#allocation4], %s1941_s24, %s1941_s24, %s1942_s25  }
 0xcaf   :  { %1938 = dma.done.wait [#allocation4], 256  }
 0xcb0   :  { %1939 = vsyncadd [#allocation4], 4294967040 }
 0xcb1   :  { %1610 = vsyncpa [#allocation3], 1 }
 0xcb2   :  { %1611 = vsyncpa [#allocation4], 1 }

</bundles_post_ra>
